<compile_context>
chip_gen: v5e
topology: v5e:2x2
jax: 0.10.0
libtpu: 0.0.40
codegen_flags: <defaults>
</compile_context>

<pallas_src>
import functools
import numpy as np
import jax
import jax.numpy as jnp
from jax.experimental import pallas as pl
from jax.experimental.pallas import tpu as pltpu

_MiB = 1024 * 1024


def _copy_kernel(x_ref, o_ref):
    """x_ref / o_ref: (TB, L) tiles — identity copy."""
    o_ref[...] = x_ref[...]


def _round_up(v, m):
    return ((v + m - 1) // m) * m


def _lane_dense_view(shape):
    """Largest lane-dense 2-D view (rows, L) of the flattened array, L a
    multiple of 128.  Returns None if total size is not a multiple of 128."""
    n = int(np.prod(shape))
    for L in (1024, 512, 256, 128):
        if n % L == 0:
            return n // L, L
    return None


def _budgets():
    """(per-tile byte target, scoped-VMEM limit) chosen per TPU generation."""
    try:
        kind = jax.devices()[0].device_kind.lower()
    except Exception:
        kind = ""
    if "v7" in kind:
        # 8 MiB tile -> 4 double-buffered tiles = 32 MiB, under v7x's 64 MiB.
        return 8 * _MiB, 40 * _MiB
    # v5e / v6e: 128 MiB physical VMEM; v5e scoped default (16 MiB) is raised.
    return 8 * _MiB, 48 * _MiB


def _identity_copy_pallas(x, *, donate=False):
    """Materializing identity copy of `x` via a tiled, lane-dense Pallas kernel."""
    itemsize = jnp.dtype(x.dtype).itemsize
    orig_shape = x.shape
    target_bytes, vmem_limit = _budgets()

    view = _lane_dense_view(orig_shape)
    if view is not None:
        R, L = view
        x2 = x.reshape(R, L)
    else:
        # Total size not a multiple of 128: keep (B, D) (or (1, N)) — a block
        # equal to the full array extent is always legal.
        x2 = x if x.ndim == 2 else x.reshape(1, -1)
        R, L = x2.shape

    total_bytes = R * L * itemsize
    if total_bytes <= target_bytes:
        # Single full-extent block — legal regardless of the (8,128) rule.
        tb = R
    else:
        # Fixed multiple-of-8 row tile; Pallas masks the partial last block.
        tb = max(8, (target_bytes // (L * itemsize)) // 8 * 8)
        tb = min(tb, _round_up(R, 8))
    grid = (pl.cdiv(R, tb),)

    out = pl.pallas_call(
        _copy_kernel,
        out_shape=jax.ShapeDtypeStruct((R, L), x2.dtype),
        grid_spec=pltpu.PrefetchScalarGridSpec(
            num_scalar_prefetch=0,
            grid=grid,
            in_specs=[pl.BlockSpec((tb, L), lambda i: (i, 0))],
            out_specs=pl.BlockSpec((tb, L), lambda i: (i, 0)),
        ),
        compiler_params=pltpu.CompilerParams(
            # independent row tiles -> parallel axis (both TCs on v7x)
            dimension_semantics=("parallel",),
            vmem_limit_bytes=vmem_limit,
        ),
        cost_estimate=pl.CostEstimate(
            flops=0, transcendentals=0, bytes_accessed=2 * total_bytes),
        # With caller-side donation this lets the output reuse the input buffer.
        input_output_aliases=({0: 0} if donate else {}),
    )(x2)
    return out.reshape(orig_shape)


def base_neuron_forward(x, h=(), *, materialize=False, donate=False):
    """Pallas equivalent of BaseNeuron.forward: returns (x, ()).

    Fast path (default): identity is free — no kernel, no HBM traffic.
    `materialize=True` forces a tiled Pallas copy (fresh output buffer)."""
    if not materialize:
        return x, ()
    return _identity_copy_pallas(x, donate=donate), ()


# Host-side helpers mirroring the rest of the module (no kernel needed).
def get_initial_state(batch_size):
    return ()


def get_initial_output(batch_size, size, dtype=jnp.float32):
    return jnp.zeros((batch_size, size), dtype=dtype)


if __name__ == "__main__":
    key = jax.random.PRNGKey(0)
    k1, k2, k3 = jax.random.split(key, 3)

    # 1) BaseNeuron(size=32): forward over a (batch, size) tensor — fast path.
    B, D = 2, 32
    x = jax.random.normal(k1, (B, D), dtype=jnp.float32)
    out, state = base_neuron_forward(x, ())
    out = jax.block_until_ready(out)
    assert state == () and out.shape == (B, D) and jnp.array_equal(out, x)

    # 2) Forced Pallas copy on the same tiny shape (64 elems -> full-block path).
    out_k, state_k = base_neuron_forward(x, (), materialize=True)
    out_k = jax.block_until_ready(out_k)
    assert state_k == () and jnp.array_equal(out_k, x)

    # 3) Forced Pallas copy on a lane-dense-able shape (16*256 -> (4, 1024) view).
    x2 = jax.random.normal(k2, (16, 256), dtype=jnp.float32)
    out2, _ = base_neuron_forward(x2, (), materialize=True)
    out2 = jax.block_until_ready(out2)
    assert out2.shape == x2.shape and jnp.array_equal(out2, x2)

    # 4) Donated / input-output-aliased kernel path under jit.
    x3 = jax.random.normal(k3, (32, 128), dtype=jnp.float32)
    x3_np = np.asarray(x3)  # keep a host copy; x3's buffer is donated below
    f = jax.jit(lambda a: base_neuron_forward(a, (), materialize=True, donate=True)[0],
                donate_argnums=0)
    out3 = jax.block_until_ready(f(x3))
    assert np.array_equal(np.asarray(out3), x3_np)

    # sanity-check the trivial helpers too
    assert get_initial_state(B) == ()
    init_out = jax.block_until_ready(get_initial_output(B, D))
    assert init_out.shape == (B, D) and jnp.all(init_out == 0)

    print("KERNEL_OK")
</pallas_src>

<mosaic_0001>
module attributes {stable_mosaic.version = 11 : i64} {
  func.func @_copy_kernel(%arg0: i32, %arg1: memref<2x32xf32, #tpu.memory_space<vmem>>, %arg2: memref<2x32xf32, #tpu.memory_space<vmem>>) attributes {dimension_semantics = [#tpu.dimension_semantics<parallel>], iteration_bounds = array<i64: 1>, scalar_prefetch = 0 : i64, scratch_operands = 0 : i64, tpu.core_type = #tpu.core_type<tc>, window_params = [{transform_indices = @transform_0, window_bounds = array<i64: 2, 32>}, {transform_indices = @transform_1, window_bounds = array<i64: 2, 32>}]} {
    %c0 = arith.constant 0 : index
    %c0_0 = arith.constant 0 : index
    %0 = vector.load %arg1[%c0, %c0_0] : memref<2x32xf32, #tpu.memory_space<vmem>>, vector<2x32xf32>
    %c0_1 = arith.constant 0 : index
    %c0_2 = arith.constant 0 : index
    %1 = vector.load %arg2[%c0_1, %c0_2] : memref<2x32xf32, #tpu.memory_space<vmem>>, vector<2x32xf32>
    tpu.vector_store %arg2[%c0_1, %c0_2], %0 {strides = array<i32>} : memref<2x32xf32, #tpu.memory_space<vmem>>, vector<2x32xf32>,
    return
  }
  func.func @transform_0(%arg0: i32) -> (i32, i32) {
    %c0_i32 = arith.constant 0 : i32
    %c0_i32_0 = arith.constant 0 : i32
    return %arg0, %c0_i32 : i32, i32
  }
  func.func @transform_1(%arg0: i32) -> (i32, i32) {
    %c0_i32 = arith.constant 0 : i32
    %c0_i32_0 = arith.constant 0 : i32
    return %arg0, %c0_i32 : i32, i32
  }
}

</mosaic_0001>

<bundles_post_ra>
// kernel: tpu_custom_call.1
= control target key start
LH: loop header
LB: loop body
LE: loop exit
PB: predicated region body
PF: predicated region fallthrough
CT: control target
= control target key end

     0   :  { %6 = vsyncpa [#allocation3], 0  ;;  %s115_s0 = inlined_call_operand.hbm [shape: f32[2,32], index: 0, kind: input, shape index: {}]   ;;  %s116_s1 = inlined_call_operand.hbm [shape: f32[2,32], index: 1, kind: output, shape index: {}]  }
   0x1   :  { %7 = vsyncpa [#allocation4], 0  ;;  %s13_s8 = sshll.u32 %s115_s0, 4  ;;  %s97_s9 = smov [#allocation2]   ;;  %s14_s8 = int_to_ptr.hbm [resolvable:$true] %s13_s8 }
   0x2   :  { %s15_s10 = sshll.u32 %s97_s9, 4  ;;  %s16_s10 = int_to_ptr.vmem [resolvable:$true] %s15_s10 }
   0x3   :  { %18 = dma.hbm_to_vmem [thread:$0]  %s14_s8, 32, %s16_s10, [#allocation3]  }
   0x4   :  { %93 = dma.done.wait [#allocation3], 32  }
   0x5   :  { %94 = vsyncadd [#allocation3], 4294967264  ;;  %s98_s11 = smov [#allocation5]   ;;  %s33_s15 = sshll.u32 %s116_s1, 4  ;;  %vm24_vm0 = vcmask 254976   ;;  %s34_s15 = int_to_ptr.hbm [resolvable:$true] %s33_s15 }
   0x6   :  { %s31_s12 = sshll.u32 %s98_s11, 4  ;;  %v23_v0 = vld [vmem:[#allocation2] sm:$0x3]  ;;  %s32_s12 = int_to_ptr.vmem [resolvable:$true] %s31_s12 }
   0x7   :  { %25 = vst.msk [vmem:[#allocation5] sm:$0x3] %vm24_vm0, %v23_v0 }
   0x8   :  { %36 = dma.vmem_to_hbm [thread:$0]  %s32_s12, 32, %s34_s15, [#allocation4]  }
   0x9   :  { %95 = dma.done.wait [#allocation4], 32  }
   0xa   :  { %96 = vsyncadd [#allocation4], 4294967264 }
   0xb   :  { %41 = vsyncpa [#allocation3], 1 }
   0xc   :  { %42 = vsyncpa [#allocation4], 1 }

</bundles_post_ra>
